<compile_context>
chip_gen: v5e
topology: v5e:2x2
jax: 0.10.0
libtpu: 0.0.40
codegen_flags: <defaults>
</compile_context>

<pallas_src>
import jax
import jax.numpy as jnp
from jax.experimental import pallas as pl
from jax.experimental.pallas import tpu as pltpu

LANE = 128     # TPU lane width
SUBLANE = 8    # TPU sublane width


def _round_up(x, m):
    return (x + m - 1) // m * m


def actor_kernel(s_ref, e_ref,
                 w1s_ref, w1e_ref, b1_ref,
                 w2_ref, b2_ref,
                 w3_ref, b3_ref,
                 wo_ref, bo_ref,
                 o_ref):
    # fc1: split-input dot (replaces the torch concat), bf16 MXU inputs,
    # f32 accumulate / bias / ReLU.
    s = s_ref[...].astype(jnp.bfloat16)
    e = e_ref[...].astype(jnp.bfloat16)
    h = (jnp.dot(s, w1s_ref[...], preferred_element_type=jnp.float32)
         + jnp.dot(e, w1e_ref[...], preferred_element_type=jnp.float32)
         + b1_ref[...])
    h = jnp.maximum(h, 0.0)

    # fc2
    h = (jnp.dot(h.astype(jnp.bfloat16), w2_ref[...],
                 preferred_element_type=jnp.float32) + b2_ref[...])
    h = jnp.maximum(h, 0.0)

    # fc3
    h = (jnp.dot(h.astype(jnp.bfloat16), w3_ref[...],
                 preferred_element_type=jnp.float32) + b3_ref[...])
    h = jnp.maximum(h, 0.0)

    # fc_out (N=1): compute wo @ h^T so the result is already lane-packed.
    # wo is stored [8, Hp] with rows 1..7 zero to keep M sublane-aligned.
    head = jnp.dot(wo_ref[...], h.astype(jnp.bfloat16).T,
                   preferred_element_type=jnp.float32)            # [8, TB]
    o_ref[...] = (head[0:1, :] + bo_ref[0]).astype(o_ref.dtype)   # [1, TB]


def actor_forward(state, env_emb, params, *, batch_tile=512):
    """state: [B, state_dim], env_emb: [B, embed_dim] -> [B, 1] (f32)."""
    state = state.astype(jnp.float32)
    env_emb = env_emb.astype(jnp.float32)
    w1s, w1e, b1, w2, b2, w3, b3, wo, bo = params

    B, sd = state.shape
    ed = env_emb.shape[1]
    Hp = w2.shape[0]  # lane-padded hidden dim (multiple of 128)

    # Batch tiling: TB must be a multiple of 128 so the lane-packed output
    # block stores are unmasked.  Cap TB at ~half the padded batch so the
    # grid has >= 2 steps whenever B allows it (v7x megacore sharding).
    batch_tile = max(LANE, _round_up(batch_tile, LANE))
    Bp = _round_up(B, LANE)
    TB = min(batch_tile, max(LANE, _round_up(Bp // 2, LANE)))
    Bp = _round_up(Bp, TB)
    if Bp != B:
        state = jnp.pad(state, ((0, Bp - B), (0, 0)))
        env_emb = jnp.pad(env_emb, ((0, Bp - B), (0, 0)))
    G = Bp // TB

    row = lambda i: (i, 0)     # activation / output tiles walk the batch
    const = lambda i: (0, 0)   # weights / biases: VMEM-resident across steps

    # VMEM budget guard: double-buffered bf16 weights + f32 biases +
    # activations.  Only kicks in once Hp grows past ~1K (v7x: 64 MiB VMEM).
    resident = 2 * ((sd + ed + 2 * Hp + SUBLANE) * Hp * 2   # bf16 weights
                    + 3 * Hp * 4                            # f32 biases
                    + TB * (sd + ed) * 4 + TB * 4)          # activations + out
    vmem_limit = None
    if resident > 24 * 1024 * 1024:
        vmem_limit = min(int(resident) + (16 << 20), 128 << 20)

    out_pack = pl.pallas_call(
        actor_kernel,
        out_shape=jax.ShapeDtypeStruct((G, TB), jnp.float32),
        grid=(G,),
        in_specs=[
            pl.BlockSpec((TB, sd), row),
            pl.BlockSpec((TB, ed), row),
            pl.BlockSpec((sd, Hp), const),
            pl.BlockSpec((ed, Hp), const),
            pl.BlockSpec((1, Hp), const),
            pl.BlockSpec((Hp, Hp), const),
            pl.BlockSpec((1, Hp), const),
            pl.BlockSpec((Hp, Hp), const),
            pl.BlockSpec((1, Hp), const),
            pl.BlockSpec((SUBLANE, Hp), const),
            pl.BlockSpec(memory_space=pltpu.MemorySpace.SMEM),   # bo (scalar)
        ],
        out_specs=pl.BlockSpec((1, TB), row),
        compiler_params=pltpu.CompilerParams(
            dimension_semantics=("parallel",),
            vmem_limit_bytes=vmem_limit),
    )(state, env_emb, w1s, w1e, b1, w2, b2, w3, b3, wo, bo)

    # Lane-packed [G, TB] -> contiguous [B, 1].
    return out_pack.reshape(-1)[:B, None]


def init_actor_params(key, state_dim, embed_dim=3, hidden_dim=256,
                      out_init_w=0.003):
    """Synthetic init mirroring Actor.init_weights shapes/ranges.

    Weights are stored transposed ([in, out]) vs. torch's [out, in], w1 is
    split into (state, emb) halves, the hidden dim is zero-padded to a
    multiple of 128, matmul weights are stored bf16, and the fc_out weight is
    stored as an [8, Hp] row block (row 0 = wo^T, rows 1..7 zero).
    """
    input_dim = state_dim + embed_dim
    Hp = _round_up(hidden_dim, LANE)
    k1, k2, k3, k4 = jax.random.split(key, 4)

    # torch fanin_init uses fanin = weight.size(0) = out_features.
    def fanin_uniform(k, in_dim, out_dim):
        v = 1.0 / jnp.sqrt(jnp.float32(out_dim))
        return jax.random.uniform(k, (in_dim, out_dim), jnp.float32,
                                  minval=-v, maxval=v)

    def pad2(a, rows, cols):
        return jnp.pad(a, ((0, rows - a.shape[0]), (0, cols - a.shape[1])))

    w1 = fanin_uniform(k1, input_dim, hidden_dim)
    w2 = fanin_uniform(k2, hidden_dim, hidden_dim)
    w3 = fanin_uniform(k3, hidden_dim, hidden_dim)
    wo = jax.random.uniform(k4, (hidden_dim, 1), jnp.float32,
                            minval=-out_init_w, maxval=out_init_w)

    w1s = pad2(w1[:state_dim], state_dim, Hp).astype(jnp.bfloat16)
    w1e = pad2(w1[state_dim:], embed_dim, Hp).astype(jnp.bfloat16)
    w2p = pad2(w2, Hp, Hp).astype(jnp.bfloat16)
    w3p = pad2(w3, Hp, Hp).astype(jnp.bfloat16)
    wop = pad2(wo.T, SUBLANE, Hp).astype(jnp.bfloat16)   # [8, Hp]

    b1 = jnp.zeros((1, Hp), jnp.float32)
    b2 = jnp.zeros((1, Hp), jnp.float32)
    b3 = jnp.zeros((1, Hp), jnp.float32)
    bo = jnp.zeros((1,), jnp.float32)                    # SMEM scalar
    return (w1s, w1e, b1, w2p, b2, w3p, b3, wop, bo)


def actor_reference(state, env_emb, params):
    """Pure-JAX reference mirroring the kernel's bf16-dot / f32-accumulate math."""
    w1s, w1e, b1, w2, b2, w3, b3, wo, bo = params
    s = state.astype(jnp.bfloat16)
    e = env_emb.astype(jnp.bfloat16)
    h = (jnp.dot(s, w1s, preferred_element_type=jnp.float32)
         + jnp.dot(e, w1e, preferred_element_type=jnp.float32) + b1)
    h = jax.nn.relu(h)
    h = jax.nn.relu(jnp.dot(h.astype(jnp.bfloat16), w2,
                            preferred_element_type=jnp.float32) + b2)
    h = jax.nn.relu(jnp.dot(h.astype(jnp.bfloat16), w3,
                            preferred_element_type=jnp.float32) + b3)
    head = jnp.dot(wo, h.astype(jnp.bfloat16).T,
                   preferred_element_type=jnp.float32)   # [8, B]
    return head[0:1, :].T + bo[0]                        # [B, 1]


if __name__ == "__main__":
    key = jax.random.PRNGKey(0)
    k_params, k_state, k_emb = jax.random.split(key, 3)

    # Small shapes consistent with the module: state_dim=13, embed_dim=3,
    # hidden_dim=32 (padded to 128 internally), batch=8.
    B, state_dim, embed_dim, hidden_dim = 8, 13, 3, 32

    params = init_actor_params(k_params, state_dim, embed_dim, hidden_dim)
    state = jax.random.normal(k_state, (B, state_dim), jnp.float32)
    env_emb = jax.random.normal(k_emb, (B, embed_dim), jnp.float32)

    out = actor_forward(state, env_emb, params)
    out = jax.block_until_ready(out)

    ref = actor_reference(state, env_emb, params)
    assert out.shape == (B, 1), out.shape
    assert jnp.allclose(out, ref, atol=1e-4, rtol=1e-3), \
        f"max err {jnp.max(jnp.abs(out - ref))}"

    print("KERNEL_OK")
</pallas_src>

<mosaic_0001>
module attributes {stable_mosaic.version = 11 : i64} {
  func.func @actor_kernel(%arg0: i32, %arg1: memref<128x13xf32, #tpu.memory_space<vmem>>, %arg2: memref<128x3xf32, #tpu.memory_space<vmem>>, %arg3: memref<13x128xbf16, #tpu.memory_space<vmem>>, %arg4: memref<3x128xbf16, #tpu.memory_space<vmem>>, %arg5: memref<1x128xf32, #tpu.memory_space<vmem>>, %arg6: memref<128x128xbf16, #tpu.memory_space<vmem>>, %arg7: memref<1x128xf32, #tpu.memory_space<vmem>>, %arg8: memref<128x128xbf16, #tpu.memory_space<vmem>>, %arg9: memref<1x128xf32, #tpu.memory_space<vmem>>, %arg10: memref<8x128xbf16, #tpu.memory_space<vmem>>, %arg11: memref<1xf32, #tpu.memory_space<smem>>, %arg12: memref<1x128xf32, #tpu.memory_space<vmem>>) attributes {dimension_semantics = [#tpu.dimension_semantics<parallel>], iteration_bounds = array<i64: 1>, scalar_prefetch = 0 : i64, scratch_operands = 0 : i64, tpu.core_type = #tpu.core_type<tc>, window_params = [{transform_indices = @transform_0, window_bounds = array<i64: 128, 13>}, {transform_indices = @transform_1, window_bounds = array<i64: 128, 3>}, {pipeline_mode = #tpu.pipeline_mode<synchronous>, transform_indices = @transform_2, window_bounds = array<i64: 13, 128>}, {pipeline_mode = #tpu.pipeline_mode<synchronous>, transform_indices = @transform_3, window_bounds = array<i64: 3, 128>}, {pipeline_mode = #tpu.pipeline_mode<synchronous>, transform_indices = @transform_4, window_bounds = array<i64: 1, 128>}, {pipeline_mode = #tpu.pipeline_mode<synchronous>, transform_indices = @transform_5, window_bounds = array<i64: 128, 128>}, {pipeline_mode = #tpu.pipeline_mode<synchronous>, transform_indices = @transform_6, window_bounds = array<i64: 1, 128>}, {pipeline_mode = #tpu.pipeline_mode<synchronous>, transform_indices = @transform_7, window_bounds = array<i64: 128, 128>}, {pipeline_mode = #tpu.pipeline_mode<synchronous>, transform_indices = @transform_8, window_bounds = array<i64: 1, 128>}, {pipeline_mode = #tpu.pipeline_mode<synchronous>, transform_indices = @transform_9, window_bounds = array<i64: 8, 128>}, {transform_indices = @transform_10, window_bounds = array<i64: 1>}, {transform_indices = @transform_11, window_bounds = array<i64: 1, 128>}]} {
    %c0 = arith.constant 0 : index
    %c0_0 = arith.constant 0 : index
    %0 = vector.load %arg1[%c0, %c0_0] : memref<128x13xf32, #tpu.memory_space<vmem>>, vector<128x13xf32>
    %1 = arith.truncf %0 : vector<128x13xf32> to vector<128x13xbf16>
    %c0_1 = arith.constant 0 : index
    %c0_2 = arith.constant 0 : index
    %2 = vector.load %arg2[%c0_1, %c0_2] : memref<128x3xf32, #tpu.memory_space<vmem>>, vector<128x3xf32>
    %3 = arith.truncf %2 : vector<128x3xf32> to vector<128x3xbf16>
    %c0_3 = arith.constant 0 : index
    %c0_4 = arith.constant 0 : index
    %4 = vector.load %arg3[%c0_3, %c0_4] : memref<13x128xbf16, #tpu.memory_space<vmem>>, vector<13x128xbf16>
    %cst = arith.constant dense<0.000000e+00> : vector<128x128xf32>
    %5 = tpu.matmul %1, %4, %cst {dimension_numbers = #tpu.dot_dimension_numbers<[1], [0], [0], [1], [0, 0, 1, 1], [], []>} : vector<128x13xbf16>, vector<13x128xbf16>, vector<128x128xf32> -> vector<128x128xf32>
    %c0_5 = arith.constant 0 : index
    %c0_6 = arith.constant 0 : index
    %6 = vector.load %arg4[%c0_5, %c0_6] : memref<3x128xbf16, #tpu.memory_space<vmem>>, vector<3x128xbf16>
    %cst_7 = arith.constant dense<0.000000e+00> : vector<128x128xf32>
    %7 = tpu.matmul %3, %6, %cst_7 {dimension_numbers = #tpu.dot_dimension_numbers<[1], [0], [0], [1], [0, 0, 1, 1], [], []>} : vector<128x3xbf16>, vector<3x128xbf16>, vector<128x128xf32> -> vector<128x128xf32>
    %8 = arith.addf %5, %7 : vector<128x128xf32>
    %c0_8 = arith.constant 0 : index
    %c0_9 = arith.constant 0 : index
    %9 = vector.load %arg5[%c0_8, %c0_9] : memref<1x128xf32, #tpu.memory_space<vmem>>, vector<1x128xf32>
    %10 = vector.broadcast %9 : vector<1x128xf32> to vector<128x128xf32>
    %11 = arith.addf %8, %10 : vector<128x128xf32>
    %cst_10 = arith.constant 0.000000e+00 : f32
    %12 = vector.broadcast %cst_10 : f32 to vector<128x128xf32>
    %13 = arith.maximumf %11, %12 : vector<128x128xf32>
    %14 = arith.truncf %13 : vector<128x128xf32> to vector<128x128xbf16>
    %c0_11 = arith.constant 0 : index
    %c0_12 = arith.constant 0 : index
    %15 = vector.load %arg6[%c0_11, %c0_12] : memref<128x128xbf16, #tpu.memory_space<vmem>>, vector<128x128xbf16>
    %cst_13 = arith.constant dense<0.000000e+00> : vector<128x128xf32>
    %16 = tpu.matmul %14, %15, %cst_13 {dimension_numbers = #tpu.dot_dimension_numbers<[1], [0], [0], [1], [0, 0, 1, 1], [], []>} : vector<128x128xbf16>, vector<128x128xbf16>, vector<128x128xf32> -> vector<128x128xf32>
    %c0_14 = arith.constant 0 : index
    %c0_15 = arith.constant 0 : index
    %17 = vector.load %arg7[%c0_14, %c0_15] : memref<1x128xf32, #tpu.memory_space<vmem>>, vector<1x128xf32>
    %18 = vector.broadcast %17 : vector<1x128xf32> to vector<128x128xf32>
    %19 = arith.addf %16, %18 : vector<128x128xf32>
    %cst_16 = arith.constant 0.000000e+00 : f32
    %20 = vector.broadcast %cst_16 : f32 to vector<128x128xf32>
    %21 = arith.maximumf %19, %20 : vector<128x128xf32>
    %22 = arith.truncf %21 : vector<128x128xf32> to vector<128x128xbf16>
    %c0_17 = arith.constant 0 : index
    %c0_18 = arith.constant 0 : index
    %23 = vector.load %arg8[%c0_17, %c0_18] : memref<128x128xbf16, #tpu.memory_space<vmem>>, vector<128x128xbf16>
    %cst_19 = arith.constant dense<0.000000e+00> : vector<128x128xf32>
    %24 = tpu.matmul %22, %23, %cst_19 {dimension_numbers = #tpu.dot_dimension_numbers<[1], [0], [0], [1], [0, 0, 1, 1], [], []>} : vector<128x128xbf16>, vector<128x128xbf16>, vector<128x128xf32> -> vector<128x128xf32>
    %c0_20 = arith.constant 0 : index
    %c0_21 = arith.constant 0 : index
    %25 = vector.load %arg9[%c0_20, %c0_21] : memref<1x128xf32, #tpu.memory_space<vmem>>, vector<1x128xf32>
    %26 = vector.broadcast %25 : vector<1x128xf32> to vector<128x128xf32>
    %27 = arith.addf %24, %26 : vector<128x128xf32>
    %cst_22 = arith.constant 0.000000e+00 : f32
    %28 = vector.broadcast %cst_22 : f32 to vector<128x128xf32>
    %29 = arith.maximumf %27, %28 : vector<128x128xf32>
    %c0_23 = arith.constant 0 : index
    %c0_24 = arith.constant 0 : index
    %30 = vector.load %arg10[%c0_23, %c0_24] : memref<8x128xbf16, #tpu.memory_space<vmem>>, vector<8x128xbf16>
    %31 = arith.truncf %29 : vector<128x128xf32> to vector<128x128xbf16>
    %32 = tpu.transpose %31, [1, 0] : vector<128x128xbf16> -> vector<128x128xbf16>
    %cst_25 = arith.constant dense<0.000000e+00> : vector<8x128xf32>
    %33 = tpu.matmul %30, %32, %cst_25 {dimension_numbers = #tpu.dot_dimension_numbers<[1], [0], [0], [1], [0, 0, 1, 1], [], []>} : vector<8x128xbf16>, vector<128x128xbf16>, vector<8x128xf32> -> vector<8x128xf32>
    %34 = vector.extract_strided_slice %33 {offsets = [0, 0], sizes = [1, 128], strides = [1, 1]} : vector<8x128xf32> to vector<1x128xf32>
    %c0_26 = arith.constant 0 : index
    %35 = memref.load %arg11[%c0_26] : memref<1xf32, #tpu.memory_space<smem>>
    %36 = vector.broadcast %35 : f32 to vector<1x128xf32>
    %37 = arith.addf %34, %36 : vector<1x128xf32>
    %c0_27 = arith.constant 0 : index
    %c0_28 = arith.constant 0 : index
    %38 = vector.load %arg12[%c0_27, %c0_28] : memref<1x128xf32, #tpu.memory_space<vmem>>, vector<1x128xf32>
    tpu.vector_store %arg12[%c0_27, %c0_28], %37 {strides = array<i32>} : memref<1x128xf32, #tpu.memory_space<vmem>>, vector<1x128xf32>,
    return
  }
  func.func @transform_0(%arg0: i32) -> (i32, i32) {
    %c0_i32 = arith.constant 0 : i32
    %c0_i32_0 = arith.constant 0 : i32
    return %arg0, %c0_i32 : i32, i32
  }
  func.func @transform_1(%arg0: i32) -> (i32, i32) {
    %c0_i32 = arith.constant 0 : i32
    %c0_i32_0 = arith.constant 0 : i32
    return %arg0, %c0_i32 : i32, i32
  }
  func.func @transform_2(%arg0: i32) -> (i32, i32) {
    %c0_i32 = arith.constant 0 : i32
    %c0_i32_0 = arith.constant 0 : i32
    %c0_i32_1 = arith.constant 0 : i32
    return %c0_i32, %c0_i32_0 : i32, i32
  }
  func.func @transform_3(%arg0: i32) -> (i32, i32) {
    %c0_i32 = arith.constant 0 : i32
    %c0_i32_0 = arith.constant 0 : i32
    %c0_i32_1 = arith.constant 0 : i32
    return %c0_i32, %c0_i32_0 : i32, i32
  }
  func.func @transform_4(%arg0: i32) -> (i32, i32) {
    %c0_i32 = arith.constant 0 : i32
    %c0_i32_0 = arith.constant 0 : i32
    %c0_i32_1 = arith.constant 0 : i32
    return %c0_i32, %c0_i32_0 : i32, i32
  }
  func.func @transform_5(%arg0: i32) -> (i32, i32) {
    %c0_i32 = arith.constant 0 : i32
    %c0_i32_0 = arith.constant 0 : i32
    %c0_i32_1 = arith.constant 0 : i32
    return %c0_i32, %c0_i32_0 : i32, i32
  }
  func.func @transform_6(%arg0: i32) -> (i32, i32) {
    %c0_i32 = arith.constant 0 : i32
    %c0_i32_0 = arith.constant 0 : i32
    %c0_i32_1 = arith.constant 0 : i32
    return %c0_i32, %c0_i32_0 : i32, i32
  }
  func.func @transform_7(%arg0: i32) -> (i32, i32) {
    %c0_i32 = arith.constant 0 : i32
    %c0_i32_0 = arith.constant 0 : i32
    %c0_i32_1 = arith.constant 0 : i32
    return %c0_i32, %c0_i32_0 : i32, i32
  }
  func.func @transform_8(%arg0: i32) -> (i32, i32) {
    %c0_i32 = arith.constant 0 : i32
    %c0_i32_0 = arith.constant 0 : i32
    %c0_i32_1 = arith.constant 0 : i32
    return %c0_i32, %c0_i32_0 : i32, i32
  }
  func.func @transform_9(%arg0: i32) -> (i32, i32) {
    %c0_i32 = arith.constant 0 : i32
    %c0_i32_0 = arith.constant 0 : i32
    %c0_i32_1 = arith.constant 0 : i32
    return %c0_i32, %c0_i32_0 : i32, i32
  }
  func.func @transform_10(%arg0: i32) -> i32 {
    %c0_i32 = arith.constant 0 : i32
    %c0_i32_0 = arith.constant 0 : i32
    return %c0_i32 : i32
  }
  func.func @transform_11(%arg0: i32) -> (i32, i32) {
    %c0_i32 = arith.constant 0 : i32
    %c0_i32_0 = arith.constant 0 : i32
    return %arg0, %c0_i32 : i32, i32
  }
}

</mosaic_0001>

<bundles_post_ra>
// kernel: tpu_custom_call.1
= control target key start
LH: loop header
LB: loop body
LE: loop exit
PB: predicated region body
PF: predicated region fallthrough
CT: control target
= control target key end

     0   :  { %vm117_vm0 = vcmask 1040384   ;;  %vm118_vm1 = vcmask 1041408   ;;  %vm203_vm2 = vcmask 1045504   ;;  %v751_v1 = vmov 65535   ;;  %s1018_s0 = inlined_call_operand.vmem [shape: f32[128,13], index: 0, kind: input, shape index: {}]   ;;  %s1019_s1 = inlined_call_operand.vmem [shape: f32[128,3], index: 1, kind: input, shape index: {}]   ;;  %s1020_s2 = inlined_call_operand.vmem [shape: bf16[13,128], index: 2, kind: input, shape index: {}]   ;;  %s1021_s3 = inlined_call_operand.vmem [shape: bf16[3,128], index: 3, kind: input, shape index: {}]   ;;  %s1022_s4 = inlined_call_operand.vmem [shape: f32[1,128], index: 4, kind: input, shape index: {}]   ;;  %s1023_s5 = inlined_call_operand.vmem [shape: bf16[128,128], index: 5, kind: input, shape index: {}]   ;;  %s1024_s6 = inlined_call_operand.vmem [shape: f32[1,128], index: 6, kind: input, shape index: {}]   ;;  %s1025_s7 = inlined_call_operand.vmem [shape: bf16[128,128], index: 7, kind: input, shape index: {}]   ;;  %s1026_s8 = inlined_call_operand.vmem [shape: f32[1,128], index: 8, kind: input, shape index: {}]   ;;  %s1027_s9 = inlined_call_operand.vmem [shape: bf16[8,128], index: 9, kind: input, shape index: {}]   ;;  %s1028_s10 = inlined_call_operand.<no memory space> [shape: f32[1], index: 10, kind: input, shape index: {}]   ;;  %s1029_s11 = inlined_call_operand.hbm [shape: f32[1,128], index: 11, kind: output, shape index: {}]  }
   0x1   :  { %v91_v0 = vld [vmem:[%s1021_s3] sm:$0x3]  ;;  %v119_v2 = vsel %vm117_vm0, 4294967295, %v751_v1  ;;  %v703_v4 = vld [vmem:[%s1020_s2] sm:$0x70]  ;;  %vm204_vm3 = vcmask 1046528  }
   0x2   :  { %v629_v3 = vld [vmem:[%s1020_s2] sm:$0xf]  ;;  %v120_v5 = vsel %vm118_vm1, %v119_v2, 0  ;;  %v205_v7 = vsel %vm203_vm2, 4294967295, %v751_v1  ;;  %v66_v9 = vld [vmem:[%s1019_s1 + $0x8] sm:$0xff]  ;;  %vm92_vm4 = vcmask 23552  }
   0x3   :  { %v630_v6 = vor.u32 %v703_v4, %v629_v3  ;;  %v65_v8 = vld [vmem:[%s1019_s1] sm:$0xff]  ;;  %v122_v11 = vand.u32 %v120_v5, %v91_v0  ;;  %v206_v12 = vsel %vm204_vm3, %v205_v7, 0  ;;  %v42_v13 = vld [vmem:[%s1018_s0 + $0x8] sm:$0xff]  ;;  %vm178_vm5 = vcmask 105472  }
   0x4   :  { %v41_v10 = vld [vmem:[%s1018_s0] sm:$0xff]  ;;  %v81_v15 = vpack.c.bf16 %v66_v9, %v65_v8 }
   0x5   :  { %v208_v14 = vand.u32 %v630_v6, %v206_v12  ;;  %131 = vmatpush.bf16.msra.mxu0 %v122_v11  ;;  %v57_v16 = vpack.c.bf16 %v42_v13, %v41_v10 }
   0x7   :  { %217 = vmatpush.bf16.msra.mxu1 %v208_v14 }
   0x8   :  { %17 = vsyncpa [#allocation4], 0  ;;  %619 = vmatmul.msk.bf16.vlgmr.msra.gmra.mxu0 %vm92_vm4, %v81_v15  ;;  %v67_v17 = vld [vmem:[%s1019_s1 + $0x10] sm:$0xff]  ;;  %v68_v18 = vld [vmem:[%s1019_s1 + $0x18] sm:$0xff]  ;;  %s752_s17 = smov [#allocation3]  }
   0x9   :  { %v43_v19 = vld [vmem:[%s1018_s0 + $0x10] sm:$0xff]  ;;  %v44_v20 = vld [vmem:[%s1018_s0 + $0x18] sm:$0xff]  ;;  %v82_v21 = vpack.c.bf16 %v68_v18, %v67_v17  ;;  %v69_v23 = vld [vmem:[%s1019_s1 + $0x20] sm:$0xff]  ;;  %s608_s18 = sshll.u32 %s752_s17, 4  ;;  %s609_s18 = int_to_ptr.vmem [resolvable:$true] %s608_s18 }
   0xa   :  { %631 = vmatmul.msk.bf16.vlgmr.msra.gmra.mxu1 %vm178_vm5, %v57_v16  ;;  %v58_v22 = vpack.c.bf16 %v44_v20, %v43_v19  ;;  %v70_v24 = vld [vmem:[%s1019_s1 + $0x28] sm:$0xff]  ;;  %v45_v25 = vld [vmem:[%s1018_s0 + $0x20] sm:$0xff]  ;;  %v71_v29 = vld [vmem:[%s1019_s1 + $0x30] sm:$0xff] }
   0xb   :  { %v46_v26 = vld [vmem:[%s1018_s0 + $0x28] sm:$0xff]  ;;  %v83_v27 = vpack.c.bf16 %v70_v24, %v69_v23  ;;  %v72_v30 = vld [vmem:[%s1019_s1 + $0x38] sm:$0xff]  ;;  %v47_v31 = vld [vmem:[%s1018_s0 + $0x30] sm:$0xff] }
   0xc   :  { %v59_v28 = vpack.c.bf16 %v46_v26, %v45_v25  ;;  %v48_v32 = vld [vmem:[%s1018_s0 + $0x38] sm:$0xff]  ;;  %v84_v33 = vpack.c.bf16 %v72_v30, %v71_v29  ;;  %v73_v35 = vld [vmem:[%s1019_s1 + $0x40] sm:$0xff]  ;;  %v74_v36 = vld [vmem:[%s1019_s1 + $0x48] sm:$0xff] }
   0xd   :  { %v60_v34 = vpack.c.bf16 %v48_v32, %v47_v31  ;;  %v49_v37 = vld [vmem:[%s1018_s0 + $0x40] sm:$0xff]  ;;  %v50_v38 = vld [vmem:[%s1018_s0 + $0x48] sm:$0xff]  ;;  %v85_v39 = vpack.c.bf16 %v74_v36, %v73_v35  ;;  %v711_v41 = vld [vmem:[%s1023_s5 + $0x38] sm:$0xff] }
   0xe   :  { %v61_v40 = vpack.c.bf16 %v50_v38, %v49_v37  ;;  %371 = vmatpush.bf16.msra.mxu2 %v711_v41  ;;  %v75_v42 = vld [vmem:[%s1019_s1 + $0x50] sm:$0xff]  ;;  %v76_v43 = vld [vmem:[%s1019_s1 + $0x58] sm:$0xff]  ;;  %v709_v49 = vld [vmem:[%s1023_s5 + $0x28] sm:$0xff] }
   0xf   :  { %v51_v44 = vld [vmem:[%s1018_s0 + $0x50] sm:$0xff]  ;;  %v52_v45 = vld [vmem:[%s1018_s0 + $0x58] sm:$0xff]  ;;  %v86_v46 = vpack.c.bf16 %v76_v43, %v75_v42  ;;  %v708_v50 = vld [vmem:[%s1023_s5 + $0x20] sm:$0xff] }
  0x10   :  { %v62_v47 = vpack.c.bf16 %v52_v45, %v51_v44  ;;  %v710_v48 = vld [vmem:[%s1023_s5 + $0x30] sm:$0xff]  ;;  %v77_v51 = vld [vmem:[%s1019_s1 + $0x60] sm:$0xff]  ;;  %v78_v52 = vld [vmem:[%s1019_s1 + $0x68] sm:$0xff] }
  0x11   :  { %v53_v53 = vld [vmem:[%s1018_s0 + $0x60] sm:$0xff]  ;;  %v54_v54 = vld [vmem:[%s1018_s0 + $0x68] sm:$0xff]  ;;  %v87_v55 = vpack.c.bf16 %v78_v52, %v77_v51  ;;  %v707_v57 = vld [vmem:[%s1023_s5 + $0x18] sm:$0xff] }
  0x12   :  { %372 = vmatpush.bf16.msra.mxu2 %v710_v48  ;;  %v63_v56 = vpack.c.bf16 %v54_v54, %v53_v53  ;;  %v706_v58 = vld [vmem:[%s1023_s5 + $0x10] sm:$0xff]  ;;  %v705_v59 = vld [vmem:[%s1023_s5 + $0x8] sm:$0xff]  ;;  %v80_v61 = vld [vmem:[%s1019_s1 + $0x78] sm:$0xff] }
  0x13   :  { %v79_v60 = vld [vmem:[%s1019_s1 + $0x70] sm:$0xff]  ;;  %v56_v63 = vld [vmem:[%s1018_s0 + $0x78] sm:$0xff]  ;;  %v704_v0 = vld [vmem:[%s1023_s5] sm:$0xff] }
  0x14   :  { %v55_v62 = vld [vmem:[%s1018_s0 + $0x70] sm:$0xff]  ;;  %v88_v1 = vpack.c.bf16 %v80_v61, %v79_v60  ;;  %v961_v6 = vld [vmem:[%s1022_s4] ss:$0 sm:$0xff]  ;;  %s610_s0 = sshll.u32 %s1029_s11, 4  ;;  %s611_s0 = int_to_ptr.hbm [resolvable:$true] %s610_s0 }
  0x15   :  { %v64_v2 = vpack.c.bf16 %v56_v63, %v55_v62 }
  0x16   :  { %373 = vmatpush.bf16.msra.mxu2 %v709_v49 }
  0x18   :  { %620 = vmatmul.msk.bf16.gmra.mxu0 %vm92_vm4, %v82_v21 }
  0x1a   :  { %632 = vmatmul.msk.bf16.gmra.mxu1 %vm178_vm5, %v58_v22  ;;  %374 = vmatpush.bf16.msra.mxu2 %v708_v50 }
  0x1e   :  { %375 = vmatpush.bf16.msra.mxu2 %v707_v57 }
  0x22   :  { %376 = vmatpush.bf16.msra.mxu2 %v706_v58 }
  0x26   :  { %377 = vmatpush.bf16.msra.mxu2 %v705_v59 }
  0x28   :  { %621 = vmatmul.msk.bf16.gmra.mxu0 %vm92_vm4, %v83_v27 }
  0x2a   :  { %633 = vmatmul.msk.bf16.gmra.mxu1 %vm178_vm5, %v59_v28  ;;  %378 = vmatpush.bf16.msra.mxu2 %v704_v0 }
  0x38   :  { %622 = vmatmul.msk.bf16.gmra.mxu0 %vm92_vm4, %v84_v33 }
  0x3a   :  { %634 = vmatmul.msk.bf16.gmra.mxu1 %vm178_vm5, %v60_v34 }
  0x48   :  { %623 = vmatmul.msk.bf16.gmra.mxu0 %vm92_vm4, %v85_v39 }
  0x4a   :  { %635 = vmatmul.msk.bf16.gmra.mxu1 %vm178_vm5, %v61_v40 }
  0x58   :  { %624 = vmatmul.msk.bf16.gmra.mxu0 %vm92_vm4, %v86_v46 }
  0x5a   :  { %636 = vmatmul.msk.bf16.gmra.mxu1 %vm178_vm5, %v62_v47 }
  0x68   :  { %625 = vmatmul.msk.bf16.gmra.mxu0 %vm92_vm4, %v87_v55 }
  0x6a   :  { %637 = vmatmul.msk.bf16.gmra.mxu1 %vm178_vm5, %v63_v56 }
  0x78   :  { %626 = vmatmul.msk.bf16.gmra.mxu0 %vm92_vm4, %v88_v1 }
  0x7a   :  { %638 = vmatmul.msk.bf16.gmra.mxu1 %vm178_vm5, %v64_v2 }
  0x85   :  { %v133_v3 = vpop.f32.mrf.mxu0 }
  0x87   :  { %v219_v4 = vpop.f32.mrf.mxu1 }
  0x88   :  { %v220_v5 = vadd.f32 %v219_v4, %v133_v3 }
  0x8a   :  { %v263_v9 = vadd.f32 %v961_v6, %v220_v5 }
  0x8c   :  { %v279_v12 = vmax.f32 %v263_v9, 0.0  ;;  %v719_v9 = vld [vmem:[%s1025_s7 + $0x38] sm:$0xff] }
  0x8d   :  { %v135_v7 = vpop.f32.mrf.mxu0  ;;  %512 = vmatpush.bf16.msra.mxu3 %v719_v9 }
  0x8f   :  { %v221_v8 = vpop.f32.mrf.mxu1 }
  0x90   :  { %v222_v10 = vadd.f32 %v221_v8, %v135_v7 }
  0x92   :  { %v264_v11 = vadd.f32 %v961_v6, %v222_v10  ;;  %v718_v10 = vld [vmem:[%s1025_s7 + $0x30] sm:$0xff] }
  0x93   :  { %513 = vmatpush.bf16.msra.mxu3 %v718_v10 }
  0x94   :  { %v280_v13 = vmax.f32 %v264_v11, 0.0 }
  0x95   :  { %v138_v14 = vpop.f32.mrf.mxu0 }
  0x96   :  { %v295_v15 = vpack.c.bf16 %v280_v13, %v279_v12  ;;  %v717_v13 = vld [vmem:[%s1025_s7 + $0x28] sm:$0xff] }
  0x97   :  { %v224_v16 = vpop.f32.mrf.mxu1  ;;  %514 = vmatpush.bf16.msra.mxu3 %v717_v13 }
  0x98   :  { %379 = vmatmul.bf16.vlgmr.msra.gmra.mxu2 %v295_v15  ;;  %v225_v17 = vadd.f32 %v224_v16, %v138_v14 }
  0x9a   :  { %v265_v20 = vadd.f32 %v961_v6, %v225_v17 }
  0x9c   :  { %v281_v23 = vmax.f32 %v265_v20, 0.0 }
  0x9d   :  { %v140_v18 = vpop.f32.mrf.mxu0 }
  0x9f   :  { %v226_v19 = vpop.f32.mrf.mxu1 }
  0xa0   :  { %v227_v21 = vadd.f32 %v226_v19, %v140_v18  ;;  %v716_v18 = vld [vmem:[%s1025_s7 + $0x20] sm:$0xff] }
  0xa1   :  { %515 = vmatpush.bf16.msra.mxu3 %v716_v18 }
  0xa2   :  { %v266_v22 = vadd.f32 %v961_v6, %v227_v21 }
  0xa4   :  { %v282_v24 = vmax.f32 %v266_v22, 0.0 }
  0xa5   :  { %v143_v25 = vpop.f32.mrf.mxu0 }
  0xa6   :  { %v296_v26 = vpack.c.bf16 %v282_v24, %v281_v23  ;;  %v715_v24 = vld [vmem:[%s1025_s7 + $0x18] sm:$0xff] }
  0xa7   :  { %v229_v27 = vpop.f32.mrf.mxu1  ;;  %516 = vmatpush.bf16.msra.mxu3 %v715_v24 }
  0xa8   :  { %384 = vmatmul.bf16.gmra.mxu2 %v296_v26  ;;  %v230_v28 = vadd.f32 %v229_v27, %v143_v25  ;;  %v714_v26 = vld [vmem:[%s1025_s7 + $0x10] sm:$0xff] }
  0xaa   :  { %v267_v31 = vadd.f32 %v961_v6, %v230_v28 }
  0xab   :  { %517 = vmatpush.bf16.msra.mxu3 %v714_v26 }
  0xac   :  { %v283_v34 = vmax.f32 %v267_v31, 0.0  ;;  %v713_v31 = vld [vmem:[%s1025_s7 + $0x8] sm:$0xff] }
  0xad   :  { %v145_v29 = vpop.f32.mrf.mxu0 }
  0xaf   :  { %v231_v30 = vpop.f32.mrf.mxu1  ;;  %518 = vmatpush.bf16.msra.mxu3 %v713_v31  ;;  %v724_v31 = vld [vmem:[%s1026_s8] ss:$0 sm:$0xff] }
  0xb0   :  { %v232_v32 = vadd.f32 %v231_v30, %v145_v29 }
  0xb2   :  { %v268_v33 = vadd.f32 %v961_v6, %v232_v32 }
  0xb4   :  { %v284_v35 = vmax.f32 %v268_v33, 0.0 }
  0xb5   :  { %v148_v36 = vpop.f32.mrf.mxu0 }
  0xb6   :  { %v297_v37 = vpack.c.bf16 %v284_v35, %v283_v34  ;;  %v712_v35 = vld [vmem:[%s1025_s7] sm:$0xff] }
  0xb7   :  { %v234_v38 = vpop.f32.mrf.mxu1  ;;  %519 = vmatpush.bf16.msra.mxu3 %v712_v35 }
  0xb8   :  { %389 = vmatmul.bf16.gmra.mxu2 %v297_v37  ;;  %v235_v39 = vadd.f32 %v234_v38, %v148_v36  ;;  %v723_v38 = vld [vmem:[%s1024_s6] ss:$0 sm:$0xff] }
  0xba   :  { %v269_v42 = vadd.f32 %v961_v6, %v235_v39 }
  0xbc   :  { %v285_v45 = vmax.f32 %v269_v42, 0.0 }
  0xbd   :  { %v150_v40 = vpop.f32.mrf.mxu0 }
  0xbf   :  { %v236_v41 = vpop.f32.mrf.mxu1 }
  0xc0   :  { %v237_v43 = vadd.f32 %v236_v41, %v150_v40 }
  0xc2   :  { %v270_v44 = vadd.f32 %v961_v6, %v237_v43 }
  0xc4   :  { %v286_v46 = vmax.f32 %v270_v44, 0.0 }
  0xc5   :  { %v153_v47 = vpop.f32.mrf.mxu0 }
  0xc6   :  { %v298_v48 = vpack.c.bf16 %v286_v46, %v285_v45 }
  0xc7   :  { %v239_v49 = vpop.f32.mrf.mxu1 }
  0xc8   :  { %394 = vmatmul.bf16.gmra.mxu2 %v298_v48  ;;  %v240_v50 = vadd.f32 %v239_v49, %v153_v47 }
  0xca   :  { %v271_v53 = vadd.f32 %v961_v6, %v240_v50 }
  0xcc   :  { %v287_v56 = vmax.f32 %v271_v53, 0.0 }
  0xcd   :  { %v155_v51 = vpop.f32.mrf.mxu0 }
  0xcf   :  { %v241_v52 = vpop.f32.mrf.mxu1 }
  0xd0   :  { %v242_v54 = vadd.f32 %v241_v52, %v155_v51 }
  0xd2   :  { %v272_v55 = vadd.f32 %v961_v6, %v242_v54 }
  0xd4   :  { %v288_v57 = vmax.f32 %v272_v55, 0.0 }
  0xd5   :  { %v158_v58 = vpop.f32.mrf.mxu0 }
  0xd6   :  { %v299_v59 = vpack.c.bf16 %v288_v57, %v287_v56 }
  0xd7   :  { %v244_v60 = vpop.f32.mrf.mxu1 }
  0xd8   :  { %399 = vmatmul.bf16.gmra.mxu2 %v299_v59  ;;  %v245_v61 = vadd.f32 %v244_v60, %v158_v58 }
  0xda   :  { %v273_v0 = vadd.f32 %v961_v6, %v245_v61 }
  0xdc   :  { %v289_v3 = vmax.f32 %v273_v0, 0.0 }
  0xdd   :  { %v160_v62 = vpop.f32.mrf.mxu0 }
  0xdf   :  { %v246_v63 = vpop.f32.mrf.mxu1 }
  0xe0   :  { %v247_v1 = vadd.f32 %v246_v63, %v160_v62 }
  0xe2   :  { %v274_v2 = vadd.f32 %v961_v6, %v247_v1 }
  0xe4   :  { %v290_v4 = vmax.f32 %v274_v2, 0.0 }
  0xe5   :  { %v163_v5 = vpop.f32.mrf.mxu0 }
  0xe6   :  { %v300_v7 = vpack.c.bf16 %v290_v4, %v289_v3 }
  0xe7   :  { %v249_v8 = vpop.f32.mrf.mxu1 }
  0xe8   :  { %404 = vmatmul.bf16.gmra.mxu2 %v300_v7  ;;  %v250_v11 = vadd.f32 %v249_v8, %v163_v5 }
  0xea   :  { %v275_v15 = vadd.f32 %v961_v6, %v250_v11 }
  0xec   :  { %v291_v19 = vmax.f32 %v275_v15, 0.0 }
  0xed   :  { %v165_v12 = vpop.f32.mrf.mxu0 }
  0xef   :  { %v251_v14 = vpop.f32.mrf.mxu1 }
  0xf0   :  { %v252_v16 = vadd.f32 %v251_v14, %v165_v12 }
  0xf2   :  { %v276_v17 = vadd.f32 %v961_v6, %v252_v16 }
  0xf4   :  { %v292_v20 = vmax.f32 %v276_v17, 0.0 }
  0xf5   :  { %v168_v21 = vpop.f32.mrf.mxu0 }
  0xf6   :  { %v301_v22 = vpack.c.bf16 %v292_v20, %v291_v19 }
  0xf7   :  { %v254_v23 = vpop.f32.mrf.mxu1 }
  0xf8   :  { %409 = vmatmul.bf16.gmra.mxu2 %v301_v22  ;;  %v255_v25 = vadd.f32 %v254_v23, %v168_v21 }
  0xfa   :  { %v277_v29 = vadd.f32 %v961_v6, %v255_v25 }
  0xfc   :  { %v293_v33 = vmax.f32 %v277_v29, 0.0 }
  0xfd   :  { %v170_v27 = vpop.f32.mrf.mxu0 }
  0xff   :  { %v256_v28 = vpop.f32.mrf.mxu1 }
 0x100   :  { %v257_v30 = vadd.f32 %v256_v28, %v170_v27 }
 0x102   :  { %v278_v32 = vadd.f32 %v961_v6, %v257_v30 }
 0x104   :  { %v294_v34 = vmax.f32 %v278_v32, 0.0 }
 0x106   :  { %v302_v36 = vpack.c.bf16 %v294_v34, %v293_v33 }
 0x108   :  { %414 = vmatmul.bf16.gmra.mxu2 %v302_v36 }
 0x11b   :  { %v380_v37 = vpop.f32.mrf.mxu2 }
 0x11c   :  { %v381_v39 = vadd.f32 %v723_v38, %v380_v37 }
 0x11e   :  { %v420_v42 = vmax.f32 %v381_v39, 0.0 }
 0x123   :  { %v382_v40 = vpop.f32.mrf.mxu2 }
 0x124   :  { %v383_v41 = vadd.f32 %v723_v38, %v382_v40 }
 0x126   :  { %v421_v6 = vmax.f32 %v383_v41, 0.0 }
 0x128   :  { %v436_v43 = vpack.c.bf16 %v421_v6, %v420_v42 }
 0x12a   :  { %520 = vmatmul.bf16.vlgmr.msra.gmra.mxu3 %v436_v43 }
 0x12b   :  { %v385_v44 = vpop.f32.mrf.mxu2 }
 0x12c   :  { %v386_v45 = vadd.f32 %v723_v38, %v385_v44 }
 0x12e   :  { %v422_v48 = vmax.f32 %v386_v45, 0.0 }
 0x133   :  { %v387_v46 = vpop.f32.mrf.mxu2 }
 0x134   :  { %v388_v47 = vadd.f32 %v723_v38, %v387_v46 }
 0x136   :  { %v423_v49 = vmax.f32 %v388_v47, 0.0 }
 0x138   :  { %v437_v50 = vpack.c.bf16 %v423_v49, %v422_v48 }
 0x13a   :  { %525 = vmatmul.bf16.gmra.mxu3 %v437_v50 }
 0x13b   :  { %v390_v51 = vpop.f32.mrf.mxu2 }
 0x13c   :  { %v391_v52 = vadd.f32 %v723_v38, %v390_v51 }
 0x13e   :  { %v424_v55 = vmax.f32 %v391_v52, 0.0 }
 0x143   :  { %v392_v53 = vpop.f32.mrf.mxu2 }
 0x144   :  { %v393_v54 = vadd.f32 %v723_v38, %v392_v53 }
 0x146   :  { %v425_v56 = vmax.f32 %v393_v54, 0.0 }
 0x148   :  { %v438_v57 = vpack.c.bf16 %v425_v56, %v424_v55 }
 0x14a   :  { %530 = vmatmul.bf16.gmra.mxu3 %v438_v57 }
 0x14b   :  { %v395_v58 = vpop.f32.mrf.mxu2 }
 0x14c   :  { %v396_v59 = vadd.f32 %v723_v38, %v395_v58 }
 0x14e   :  { %v426_v62 = vmax.f32 %v396_v59, 0.0 }
 0x153   :  { %v397_v60 = vpop.f32.mrf.mxu2 }
 0x154   :  { %v398_v61 = vadd.f32 %v723_v38, %v397_v60 }
 0x156   :  { %v427_v63 = vmax.f32 %v398_v61, 0.0 }
 0x158   :  { %v439_v0 = vpack.c.bf16 %v427_v63, %v426_v62 }
 0x15a   :  { %535 = vmatmul.bf16.gmra.mxu3 %v439_v0 }
 0x15b   :  { %v400_v1 = vpop.f32.mrf.mxu2 }
 0x15c   :  { %v401_v2 = vadd.f32 %v723_v38, %v400_v1 }
 0x15e   :  { %v428_v5 = vmax.f32 %v401_v2, 0.0 }
 0x163   :  { %v402_v3 = vpop.f32.mrf.mxu2 }
 0x164   :  { %v403_v4 = vadd.f32 %v723_v38, %v402_v3 }
 0x166   :  { %v429_v7 = vmax.f32 %v403_v4, 0.0 }
 0x168   :  { %v440_v8 = vpack.c.bf16 %v429_v7, %v428_v5 }
 0x16a   :  { %540 = vmatmul.bf16.gmra.mxu3 %v440_v8 }
 0x16b   :  { %v405_v9 = vpop.f32.mrf.mxu2 }
 0x16c   :  { %v406_v10 = vadd.f32 %v723_v38, %v405_v9 }
 0x16e   :  { %v430_v13 = vmax.f32 %v406_v10, 0.0 }
 0x173   :  { %v407_v11 = vpop.f32.mrf.mxu2 }
 0x174   :  { %v408_v12 = vadd.f32 %v723_v38, %v407_v11 }
 0x176   :  { %v431_v14 = vmax.f32 %v408_v12, 0.0 }
 0x178   :  { %v441_v15 = vpack.c.bf16 %v431_v14, %v430_v13 }
 0x17a   :  { %545 = vmatmul.bf16.gmra.mxu3 %v441_v15 }
 0x17b   :  { %v410_v16 = vpop.f32.mrf.mxu2 }
 0x17c   :  { %v411_v17 = vadd.f32 %v723_v38, %v410_v16 }
 0x17e   :  { %v432_v20 = vmax.f32 %v411_v17, 0.0 }
 0x183   :  { %v412_v18 = vpop.f32.mrf.mxu2 }
 0x184   :  { %v413_v19 = vadd.f32 %v723_v38, %v412_v18 }
 0x186   :  { %v433_v21 = vmax.f32 %v413_v19, 0.0 }
 0x188   :  { %v442_v22 = vpack.c.bf16 %v433_v21, %v432_v20 }
 0x18a   :  { %550 = vmatmul.bf16.gmra.mxu3 %v442_v22 }
 0x18b   :  { %v415_v23 = vpop.f32.mrf.mxu2 }
 0x18c   :  { %v416_v24 = vadd.f32 %v723_v38, %v415_v23  ;;  %v577_v23 = vld [vmem:[%s1027_s9] sm:$0xf] }
 0x18e   :  { %v434_v27 = vmax.f32 %v416_v24, 0.0  ;;  %v600_v24 = vstv %s1028_s10 }
 0x193   :  { %v417_v25 = vpop.f32.mrf.mxu2 }
 0x194   :  { %v418_v26 = vadd.f32 %v723_v38, %v417_v25 }
 0x196   :  { %v435_v28 = vmax.f32 %v418_v26, 0.0 }
 0x198   :  { %v443_v29 = vpack.c.bf16 %v435_v28, %v434_v27 }
 0x19a   :  { %555 = vmatmul.bf16.gmra.mxu3 %v443_v29 }
 0x1ad   :  { %v521_v30 = vpop.f32.mrf.mxu3 }
 0x1ae   :  { %v522_v32 = vadd.f32 %v724_v31, %v521_v30 }
 0x1b0   :  { %v561_v35 = vmax.f32 %v522_v32, 0.0 }
 0x1b5   :  { %v523_v33 = vpop.f32.mrf.mxu3 }
 0x1b6   :  { %v524_v34 = vadd.f32 %v724_v31, %v523_v33 }
 0x1b8   :  { %v562_v36 = vmax.f32 %v524_v34, 0.0 }
 0x1ba   :  { %v578_v37 = vpack.c.bf16 %v562_v36, %v561_v35 }
 0x1bd   :  { %v526_v39 = vpop.f32.mrf.mxu3 }
 0x1be   :  { %v527_v40 = vadd.f32 %v724_v31, %v526_v39 }
 0x1c0   :  { %v563_v38 = vmax.f32 %v527_v40, 0.0 }
 0x1c5   :  { %v528_v41 = vpop.f32.mrf.mxu3 }
 0x1c6   :  { %v529_v42 = vadd.f32 %v724_v31, %v528_v41 }
 0x1c8   :  { %v564_v6 = vmax.f32 %v529_v42, 0.0 }
 0x1ca   :  { %v579_v43 = vpack.c.bf16 %v564_v6, %v563_v38 }
 0x1cd   :  { %v531_v44 = vpop.f32.mrf.mxu3 }
 0x1ce   :  { %v532_v45 = vadd.f32 %v724_v31, %v531_v44 }
 0x1d0   :  { %v565_v48 = vmax.f32 %v532_v45, 0.0 }
 0x1d5   :  { %v533_v46 = vpop.f32.mrf.mxu3 }
 0x1d6   :  { %v534_v47 = vadd.f32 %v724_v31, %v533_v46 }
 0x1d8   :  { %v566_v49 = vmax.f32 %v534_v47, 0.0 }
 0x1da   :  { %v580_v50 = vpack.c.bf16 %v566_v49, %v565_v48 }
 0x1dd   :  { %v536_v51 = vpop.f32.mrf.mxu3 }
 0x1de   :  { %v537_v52 = vadd.f32 %v724_v31, %v536_v51 }
 0x1e0   :  { %v567_v55 = vmax.f32 %v537_v52, 0.0 }
 0x1e5   :  { %v538_v53 = vpop.f32.mrf.mxu3 }
 0x1e6   :  { %v539_v54 = vadd.f32 %v724_v31, %v538_v53 }
 0x1e8   :  { %v568_v56 = vmax.f32 %v539_v54, 0.0 }
 0x1ea   :  { %v581_v57 = vpack.c.bf16 %v568_v56, %v567_v55 }
 0x1ed   :  { %v541_v58 = vpop.f32.mrf.mxu3 }
 0x1ee   :  { %v542_v59 = vadd.f32 %v724_v31, %v541_v58 }
 0x1f0   :  { %v569_v62 = vmax.f32 %v542_v59, 0.0 }
 0x1f5   :  { %v543_v60 = vpop.f32.mrf.mxu3 }
 0x1f6   :  { %v544_v61 = vadd.f32 %v724_v31, %v543_v60 }
 0x1f8   :  { %v570_v63 = vmax.f32 %v544_v61, 0.0 }
 0x1fa   :  { %v582_v0 = vpack.c.bf16 %v570_v63, %v569_v62 }
 0x1fd   :  { %v546_v1 = vpop.f32.mrf.mxu3 }
 0x1fe   :  { %v547_v19 = vadd.f32 %v724_v31, %v546_v1 }
 0x200   :  { %v571_v21 = vmax.f32 %v547_v19, 0.0 }
 0x205   :  { %v548_v2 = vpop.f32.mrf.mxu3 }
 0x206   :  { %v549_v17 = vadd.f32 %v724_v31, %v548_v2 }
 0x208   :  { %v572_v20 = vmax.f32 %v549_v17, 0.0 }
 0x20a   :  { %v583_v22 = vpack.c.bf16 %v572_v20, %v571_v21 }
 0x20d   :  { %v551_v3 = vpop.f32.mrf.mxu3 }
 0x20e   :  { %v552_v14 = vadd.f32 %v724_v31, %v551_v3 }
 0x210   :  { %v573_v16 = vmax.f32 %v552_v14, 0.0 }
 0x215   :  { %v553_v4 = vpop.f32.mrf.mxu3 }
 0x216   :  { %v554_v12 = vadd.f32 %v724_v31, %v553_v4 }
 0x218   :  { %v574_v15 = vmax.f32 %v554_v12, 0.0 }
 0x21a   :  { %v584_v18 = vpack.c.bf16 %v574_v15, %v573_v16 }
 0x21d   :  { %v556_v5 = vpop.f32.mrf.mxu3 }
 0x21e   :  { %v557_v7 = vadd.f32 %v724_v31, %v556_v5 }
 0x220   :  { %v575_v10 = vmax.f32 %v557_v7, 0.0 }
 0x225   :  { %v558_v8 = vpop.f32.mrf.mxu3 }
 0x226   :  { %v559_v9 = vadd.f32 %v724_v31, %v558_v8 }
 0x228   :  { %v576_v11 = vmax.f32 %v559_v9, 0.0 }
 0x22a   :  { %v585_v13 = vpack.c.bf16 %v576_v11, %v575_v10 }
 0x22c   :  { %586 = vmatpush.bf16.xpose.msrb.mxu0 %v585_v13 }
 0x234   :  { %587 = vmatpush.bf16.xpose.msrb.mxu0 %v584_v18 }
 0x23c   :  { %588 = vmatpush.bf16.xpose.msrb.mxu0 %v583_v22 }
 0x244   :  { %589 = vmatpush.bf16.xpose.msrb.mxu0 %v582_v0 }
 0x24c   :  { %590 = vmatpush.bf16.xpose.msrb.mxu0 %v581_v57 }
 0x254   :  { %591 = vmatpush.bf16.xpose.msrb.mxu0 %v580_v50 }
 0x25c   :  { %592 = vmatpush.bf16.xpose.msrb.mxu0 %v579_v43 }
 0x264   :  { %593 = vmatpush.bf16.xpose.msrb.mxu0 %v578_v37 }
 0x26b   :  { %594 = vmatmul.bf16.vlgmr.msrb.gmra.mxu0 %v577_v23 }
 0x2e8   :  { %v595_v25 = vpop.f32.mrf.mxu0 }
 0x2e9   :  { %v601_v26 = vadd.f32 %v600_v24, %v595_v25 }
 0x2eb   :  { %602 = vst [vmem:[#allocation3] sm:$0x1] %v601_v26 }
 0x2ec   :  { %613 = dma.vmem_to_hbm [thread:$0]  %s609_s18, 16, %s611_s0, [#allocation4]  }
 0x2f0   :  { %v597_v27 = vpop.f32.mrf.mxu0 }
 0x2f1   :  { %749 = dma.done.wait [#allocation4], 16  }
 0x2f2   :  { %750 = vsyncadd [#allocation4], 4294967280 }
 0x2f3   :  { %618 = vsyncpa [#allocation4], 1 }

</bundles_post_ra>
